<compile_context>
chip_gen: v7x
topology: tpu7x:2x2x1
jax: 0.10.0
libtpu: 0.0.40
codegen_flags: <defaults>
</compile_context>

<pallas_src>
import functools

import jax
import jax.numpy as jnp
from jax import lax
from jax.experimental import pallas as pl
from jax.experimental.pallas import tpu as pltpu


def _ternarize(w, delta):
    # TernarizeConv2d forward: quantize master weights to {-1, 0, +1} with abs threshold delta.
    return jnp.where(w > delta, 1.0, jnp.where(w < -delta, -1.0, 0.0)).astype(jnp.float32)


def _basic_block_kernel(x_ref, w1_ref, w2_ref, mask_ref, bn_ref, out_ref, *, W, lanes):
    # x_ref   : (Cin, lanes)   Nb images, channels on sublanes, Nb*H*W on lanes
    # w1_ref  : (Cout, 9*Cin)  ternarized conv1 weights with bn1 scale folded in
    # w2_ref  : (Cout, 9*Cout) ternarized conv2 weights
    # mask_ref: (9, lanes)     1.0 where the (dy,dx)-shifted position is inside its image
    # bn_ref  : (Cout, 3)      columns = [bn1 shift, bn2 scale, bn2 shift]
    # out_ref : (Cout, lanes)
    x = x_ref[...]                     # also the identity residual (single DMA of x)
    mask = mask_ref[...]
    b1 = bn_ref[:, 0:1]
    s2 = bn_ref[:, 1:2]
    b2 = bn_ref[:, 2:3]

    def im2col_3x3(h):
        # (C, lanes) -> (9*C, lanes); row block t = (dy+1)*3+(dx+1) holds h lane-rotated by
        # off = dy*W+dx, zeroed wherever the shifted source is outside its own image
        # (this also kills circular-wrap and cross-image bleed from the rotate).
        taps = []
        t = 0
        for dy in (-1, 0, 1):
            for dx in (-1, 0, 1):
                off = dy * W + dx
                if off == 0:
                    taps.append(h)                                   # center tap: always valid
                else:
                    shifted = pltpu.roll(h, shift=(-off) % lanes, axis=1)
                    taps.append(shifted * mask[t:t + 1, :])
                t += 1
        return jnp.concatenate(taps, axis=0)                         # (9*C, lanes)

    # ---- conv1 (3x3, pad=1) as a single MXU matmul; bn1 scale pre-folded, + shift + Hardtanh
    acc1 = jnp.dot(w1_ref[...], im2col_3x3(x), preferred_element_type=jnp.float32)
    h1 = jnp.clip(acc1 + b1, -1.0, 1.0)

    # ---- conv2 (3x3, pad=1), identity residual, folded bn2 + Hardtanh ----
    acc2 = jnp.dot(w2_ref[...], im2col_3x3(h1), preferred_element_type=jnp.float32)
    out_ref[...] = jnp.clip((acc2 + x) * s2 + b2, -1.0, 1.0).astype(out_ref.dtype)


def _pick_images_per_step(N, HW, C):
    """Batch enough images per grid step for >=2048 lanes, within a VMEM budget."""
    target_lanes = 2048
    nb = min(N, max(1, -(-target_lanes // HW)))          # ceil(target/HW), clamped to N
    # Dominant per-step VMEM: two (9C, nb*HW) f32 im2col temporaries + a few (C, nb*HW) tiles.
    per_img_bytes = (2 * 9 * C + 6 * C) * HW * 4
    budget = 8 * 1024 * 1024                             # conservative vs v7x's 64 MiB VMEM
    nb = min(nb, max(1, budget // max(per_img_bytes, 1)))
    nb = max(1, min(nb, N))
    while N % nb != 0:                                   # need an even grid
        nb -= 1
    return nb


def basic_block_forward(x_nchw, params, *, delta=0.3):
    # TODO(synk): stride>1 and the optional `downsample` module are not implemented
    #             (this covers the default BasicBlock(planes, planes) configuration).
    eps = 1e-5
    N, Cin, H, W = x_nchw.shape
    HW = H * W
    w1, w2 = params["conv1_w"], params["conv2_w"]          # (Cout,Cin,3,3), (Cout,Cout,3,3)
    Cout = w1.shape[0]
    assert Cin == Cout, "identity residual requires inplanes == planes (downsample=None)"
    assert HW % 128 == 0, "H*W should be a multiple of 128 for the lane-dense layout"

    nb = _pick_images_per_step(N, HW, Cin)
    lanes = nb * HW
    grid = (N // nb,)

    # Fold eval-mode BatchNorm into per-channel scale/shift.
    s1 = params["bn1_gamma"] / jnp.sqrt(params["bn1_var"] + eps)
    b1 = params["bn1_beta"] - params["bn1_mean"] * s1
    s2 = params["bn2_gamma"] / jnp.sqrt(params["bn2_var"] + eps)
    b2 = params["bn2_beta"] - params["bn2_mean"] * s2

    # Ternarize + fold the 9 taps into the contraction dim: (O,I,3,3) -> (O, 9*I),
    # column index = (ky*3+kx)*I + ci (matches the im2col row order in the kernel).
    w1_2d = _ternarize(w1, delta).transpose(0, 2, 3, 1).reshape(Cout, 9 * Cin)
    w1_2d = s1[:, None] * w1_2d                      # fold bn1 scale into conv1 weights (free)
    w2_2d = _ternarize(w2, delta).transpose(0, 2, 3, 1).reshape(Cout, 9 * Cout)

    # Pack the remaining per-channel vectors into one (Cout, 3) block: [b1, s2, b2].
    bn_pack = jnp.concatenate(
        [b1.reshape(Cout, 1), s2.reshape(Cout, 1), b2.reshape(Cout, 1)], axis=1
    ).astype(jnp.float32)

    # Per-tap border-validity mask for ONE image, tiled across the nb images in a step
    # (lane index = n_local*HW + y*W + x, so tiling along lanes matches the layout).
    yy, xx = jnp.meshgrid(jnp.arange(H), jnp.arange(W), indexing="ij")
    yy = yy.reshape(1, HW)
    xx = xx.reshape(1, HW)
    rows = []
    for dy in (-1, 0, 1):
        for dx in (-1, 0, 1):
            rows.append((yy + dy >= 0) & (yy + dy < H) & (xx + dx >= 0) & (xx + dx < W))
    tap_mask = jnp.concatenate(rows, axis=0).astype(jnp.float32)       # (9, HW)
    tap_mask = jnp.tile(tap_mask, (1, nb))                             # (9, lanes)

    # Batched lane-dense layout: (N, C, H, W) -> (C, N*HW).
    x_lanes = (x_nchw.reshape(N, Cin, HW).astype(jnp.float32)
               .transpose(1, 0, 2).reshape(Cin, N * HW))

    kernel = functools.partial(_basic_block_kernel, W=W, lanes=lanes)

    out_lanes = pl.pallas_call(
        kernel,
        out_shape=jax.ShapeDtypeStruct((Cout, N * HW), jnp.float32),
        grid=grid,
        in_specs=[
            pl.BlockSpec((Cin, lanes), lambda i: (0, i)),        # x (also the residual)
            pl.BlockSpec((Cout, 9 * Cin), lambda i: (0, 0)),     # conv1 weights (bn1-scaled)
            pl.BlockSpec((Cout, 9 * Cout), lambda i: (0, 0)),    # conv2 weights
            pl.BlockSpec((9, lanes), lambda i: (0, 0)),          # tap validity mask
            pl.BlockSpec((Cout, 3), lambda i: (0, 0)),           # packed [b1, s2, b2]
        ],
        out_specs=pl.BlockSpec((Cout, lanes), lambda i: (0, i)),
        compiler_params=pltpu.CompilerParams(dimension_semantics=("parallel",)),
    )(x_lanes, w1_2d, w2_2d, tap_mask, bn_pack)

    # (C, N*HW) -> (N, C, H, W)
    return out_lanes.reshape(Cout, N, HW).transpose(1, 0, 2).reshape(N, Cout, H, W)


def _reference(x_nchw, params, *, delta=0.3):
    """Pure-JAX reference (same semantics) for validation."""
    eps = 1e-5
    x = jnp.transpose(x_nchw, (0, 2, 3, 1)).astype(jnp.float32)

    def conv(h, w):
        w_hwio = jnp.transpose(_ternarize(w, delta), (2, 3, 1, 0))
        return lax.conv_general_dilated(h, w_hwio, (1, 1), ((1, 1), (1, 1)),
                                        dimension_numbers=("NHWC", "HWIO", "NHWC"))

    def bn(h, g, b, m, v):
        return (h - m) / jnp.sqrt(v + eps) * g + b

    out = conv(x, params["conv1_w"])
    out = bn(out, params["bn1_gamma"], params["bn1_beta"], params["bn1_mean"], params["bn1_var"])
    out = jnp.clip(out, -1.0, 1.0)
    out = conv(out, params["conv2_w"])
    out = out + x
    out = bn(out, params["bn2_gamma"], params["bn2_beta"], params["bn2_mean"], params["bn2_var"])
    out = jnp.clip(out, -1.0, 1.0)
    return jnp.transpose(out, (0, 3, 1, 2))


def _init_params(key, inplanes, planes):
    ks = jax.random.split(key, 10)
    return {
        "conv1_w":   jax.random.normal(ks[0], (planes, inplanes, 3, 3), jnp.float32) * 0.5,
        "conv2_w":   jax.random.normal(ks[1], (planes, planes, 3, 3), jnp.float32) * 0.5,
        "bn1_gamma": jax.random.uniform(ks[2], (planes,), jnp.float32, 0.5, 1.5),
        "bn1_beta":  jax.random.normal(ks[3], (planes,), jnp.float32) * 0.1,
        "bn1_mean":  jax.random.normal(ks[4], (planes,), jnp.float32) * 0.1,
        "bn1_var":   jax.random.uniform(ks[5], (planes,), jnp.float32, 0.5, 1.5),
        "bn2_gamma": jax.random.uniform(ks[6], (planes,), jnp.float32, 0.5, 1.5),
        "bn2_beta":  jax.random.normal(ks[7], (planes,), jnp.float32) * 0.1,
        "bn2_mean":  jax.random.normal(ks[8], (planes,), jnp.float32) * 0.1,
        "bn2_var":   jax.random.uniform(ks[9], (planes,), jnp.float32, 0.5, 1.5),
    }


if __name__ == "__main__":
    key = jax.random.PRNGKey(0)
    k_x, k_p = jax.random.split(key)

    N, C, H, W = 2, 8, 16, 16          # inplanes == planes == 8 (identity residual)
    delta = 0.3

    x = jax.random.normal(k_x, (N, C, H, W), jnp.float32)
    params = _init_params(k_p, C, C)

    out = basic_block_forward(x, params, delta=delta)
    out = jax.block_until_ready(out)

    ref = jax.block_until_ready(_reference(x, params, delta=delta))
    assert out.shape == (N, C, H, W)
    assert jnp.allclose(out, ref, atol=1e-4, rtol=1e-4), "Pallas kernel mismatch vs JAX reference"

    print("KERNEL_OK")
</pallas_src>

<mosaic_0001>
module attributes {stable_mosaic.version = 11 : i64} {
  func.func @_basic_block_kernel(%arg0: i32, %arg1: memref<8x512xf32, #tpu.memory_space<vmem>>, %arg2: memref<8x72xf32, #tpu.memory_space<vmem>>, %arg3: memref<8x72xf32, #tpu.memory_space<vmem>>, %arg4: memref<9x512xf32, #tpu.memory_space<vmem>>, %arg5: memref<8x3xf32, #tpu.memory_space<vmem>>, %arg6: memref<8x512xf32, #tpu.memory_space<vmem>>) attributes {dimension_semantics = [#tpu.dimension_semantics<parallel>], iteration_bounds = array<i64: 1>, scalar_prefetch = 0 : i64, scratch_operands = 0 : i64, tpu.core_type = #tpu.core_type<tc>, window_params = [{transform_indices = @transform_0, window_bounds = array<i64: 8, 512>}, {pipeline_mode = #tpu.pipeline_mode<synchronous>, transform_indices = @transform_1, window_bounds = array<i64: 8, 72>}, {pipeline_mode = #tpu.pipeline_mode<synchronous>, transform_indices = @transform_2, window_bounds = array<i64: 8, 72>}, {pipeline_mode = #tpu.pipeline_mode<synchronous>, transform_indices = @transform_3, window_bounds = array<i64: 9, 512>}, {pipeline_mode = #tpu.pipeline_mode<synchronous>, transform_indices = @transform_4, window_bounds = array<i64: 8, 3>}, {transform_indices = @transform_5, window_bounds = array<i64: 8, 512>}]} {
    %c0 = arith.constant 0 : index
    %c0_0 = arith.constant 0 : index
    %0 = vector.load %arg1[%c0, %c0_0] : memref<8x512xf32, #tpu.memory_space<vmem>>, vector<8x512xf32>
    %c0_1 = arith.constant 0 : index
    %c0_2 = arith.constant 0 : index
    %1 = vector.load %arg4[%c0_1, %c0_2] : memref<9x512xf32, #tpu.memory_space<vmem>>, vector<9x512xf32>
    %c0_3 = arith.constant 0 : index
    %c0_4 = arith.constant 0 : index
    %2 = vector.load %arg5[%c0_3, %c0_4] : memref<8x3xf32, #tpu.memory_space<vmem>>, vector<8x1xf32>
    %c0_5 = arith.constant 0 : index
    %c1 = arith.constant 1 : index
    %3 = vector.load %arg5[%c0_5, %c1] : memref<8x3xf32, #tpu.memory_space<vmem>>, vector<8x1xf32>
    %c0_6 = arith.constant 0 : index
    %c2 = arith.constant 2 : index
    %4 = vector.load %arg5[%c0_6, %c2] : memref<8x3xf32, #tpu.memory_space<vmem>>, vector<8x1xf32>
    %c0_7 = arith.constant 0 : index
    %c0_8 = arith.constant 0 : index
    %5 = vector.load %arg2[%c0_7, %c0_8] : memref<8x72xf32, #tpu.memory_space<vmem>>, vector<8x72xf32>
    %c17_i32 = arith.constant 17 : i32
    %6 = tpu.dynamic_rotate %0 by %c17_i32 dim 1 : vector<8x512xf32>, i32 -> vector<8x512xf32>
    %7 = vector.extract_strided_slice %1 {offsets = [0, 0], sizes = [1, 512], strides = [1, 1]} : vector<9x512xf32> to vector<1x512xf32>
    %8 = vector.broadcast %7 : vector<1x512xf32> to vector<8x512xf32>
    %9 = arith.mulf %6, %8 : vector<8x512xf32>
    %c16_i32 = arith.constant 16 : i32
    %10 = tpu.dynamic_rotate %0 by %c16_i32 dim 1 : vector<8x512xf32>, i32 -> vector<8x512xf32>
    %11 = vector.extract_strided_slice %1 {offsets = [1, 0], sizes = [1, 512], strides = [1, 1]} : vector<9x512xf32> to vector<1x512xf32>
    %12 = vector.broadcast %11 : vector<1x512xf32> to vector<8x512xf32>
    %13 = arith.mulf %10, %12 : vector<8x512xf32>
    %c15_i32 = arith.constant 15 : i32
    %14 = tpu.dynamic_rotate %0 by %c15_i32 dim 1 : vector<8x512xf32>, i32 -> vector<8x512xf32>
    %15 = vector.extract_strided_slice %1 {offsets = [2, 0], sizes = [1, 512], strides = [1, 1]} : vector<9x512xf32> to vector<1x512xf32>
    %16 = vector.broadcast %15 : vector<1x512xf32> to vector<8x512xf32>
    %17 = arith.mulf %14, %16 : vector<8x512xf32>
    %c1_i32 = arith.constant 1 : i32
    %18 = tpu.dynamic_rotate %0 by %c1_i32 dim 1 : vector<8x512xf32>, i32 -> vector<8x512xf32>
    %19 = vector.extract_strided_slice %1 {offsets = [3, 0], sizes = [1, 512], strides = [1, 1]} : vector<9x512xf32> to vector<1x512xf32>
    %20 = vector.broadcast %19 : vector<1x512xf32> to vector<8x512xf32>
    %21 = arith.mulf %18, %20 : vector<8x512xf32>
    %c511_i32 = arith.constant 511 : i32
    %22 = tpu.dynamic_rotate %0 by %c511_i32 dim 1 : vector<8x512xf32>, i32 -> vector<8x512xf32>
    %23 = vector.extract_strided_slice %1 {offsets = [5, 0], sizes = [1, 512], strides = [1, 1]} : vector<9x512xf32> to vector<1x512xf32>
    %24 = vector.broadcast %23 : vector<1x512xf32> to vector<8x512xf32>
    %25 = arith.mulf %22, %24 : vector<8x512xf32>
    %c497_i32 = arith.constant 497 : i32
    %26 = tpu.dynamic_rotate %0 by %c497_i32 dim 1 : vector<8x512xf32>, i32 -> vector<8x512xf32>
    %27 = vector.extract_strided_slice %1 {offsets = [6, 0], sizes = [1, 512], strides = [1, 1]} : vector<9x512xf32> to vector<1x512xf32>
    %28 = vector.broadcast %27 : vector<1x512xf32> to vector<8x512xf32>
    %29 = arith.mulf %26, %28 : vector<8x512xf32>
    %c496_i32 = arith.constant 496 : i32
    %30 = tpu.dynamic_rotate %0 by %c496_i32 dim 1 : vector<8x512xf32>, i32 -> vector<8x512xf32>
    %31 = vector.extract_strided_slice %1 {offsets = [7, 0], sizes = [1, 512], strides = [1, 1]} : vector<9x512xf32> to vector<1x512xf32>
    %32 = vector.broadcast %31 : vector<1x512xf32> to vector<8x512xf32>
    %33 = arith.mulf %30, %32 : vector<8x512xf32>
    %c495_i32 = arith.constant 495 : i32
    %34 = tpu.dynamic_rotate %0 by %c495_i32 dim 1 : vector<8x512xf32>, i32 -> vector<8x512xf32>
    %35 = vector.extract_strided_slice %1 {offsets = [8, 0], sizes = [1, 512], strides = [1, 1]} : vector<9x512xf32> to vector<1x512xf32>
    %36 = vector.broadcast %35 : vector<1x512xf32> to vector<8x512xf32>
    %37 = arith.mulf %34, %36 : vector<8x512xf32>
    %38 = tpu.concatenate %9, %13, %17, %21, %0, %25, %29, %33, %37 in 0 : vector<8x512xf32>, vector<8x512xf32>, vector<8x512xf32>, vector<8x512xf32>, vector<8x512xf32>, vector<8x512xf32>, vector<8x512xf32>, vector<8x512xf32>, vector<8x512xf32> -> vector<72x512xf32>
    %cst = arith.constant dense<0.000000e+00> : vector<8x512xf32>
    %39 = tpu.matmul %5, %38, %cst {dimension_numbers = #tpu.dot_dimension_numbers<[1], [0], [0], [1], [0, 0, 1, 1], [], []>} : vector<8x72xf32>, vector<72x512xf32>, vector<8x512xf32> -> vector<8x512xf32>
    %40 = vector.broadcast %2 : vector<8x1xf32> to vector<8x512xf32>
    %41 = arith.addf %39, %40 : vector<8x512xf32>
    %cst_9 = arith.constant -1.000000e+00 : f32
    %cst_10 = arith.constant 1.000000e+00 : f32
    %42 = vector.broadcast %cst_9 : f32 to vector<8x512xf32>
    %43 = arith.maximumf %42, %41 : vector<8x512xf32>
    %44 = vector.broadcast %cst_10 : f32 to vector<8x512xf32>
    %45 = arith.minimumf %44, %43 : vector<8x512xf32>
    %c0_11 = arith.constant 0 : index
    %c0_12 = arith.constant 0 : index
    %46 = vector.load %arg3[%c0_11, %c0_12] : memref<8x72xf32, #tpu.memory_space<vmem>>, vector<8x72xf32>
    %c17_i32_13 = arith.constant 17 : i32
    %47 = tpu.dynamic_rotate %45 by %c17_i32_13 dim 1 : vector<8x512xf32>, i32 -> vector<8x512xf32>
    %48 = vector.extract_strided_slice %1 {offsets = [0, 0], sizes = [1, 512], strides = [1, 1]} : vector<9x512xf32> to vector<1x512xf32>
    %49 = vector.broadcast %48 : vector<1x512xf32> to vector<8x512xf32>
    %50 = arith.mulf %47, %49 : vector<8x512xf32>
    %c16_i32_14 = arith.constant 16 : i32
    %51 = tpu.dynamic_rotate %45 by %c16_i32_14 dim 1 : vector<8x512xf32>, i32 -> vector<8x512xf32>
    %52 = vector.extract_strided_slice %1 {offsets = [1, 0], sizes = [1, 512], strides = [1, 1]} : vector<9x512xf32> to vector<1x512xf32>
    %53 = vector.broadcast %52 : vector<1x512xf32> to vector<8x512xf32>
    %54 = arith.mulf %51, %53 : vector<8x512xf32>
    %c15_i32_15 = arith.constant 15 : i32
    %55 = tpu.dynamic_rotate %45 by %c15_i32_15 dim 1 : vector<8x512xf32>, i32 -> vector<8x512xf32>
    %56 = vector.extract_strided_slice %1 {offsets = [2, 0], sizes = [1, 512], strides = [1, 1]} : vector<9x512xf32> to vector<1x512xf32>
    %57 = vector.broadcast %56 : vector<1x512xf32> to vector<8x512xf32>
    %58 = arith.mulf %55, %57 : vector<8x512xf32>
    %c1_i32_16 = arith.constant 1 : i32
    %59 = tpu.dynamic_rotate %45 by %c1_i32_16 dim 1 : vector<8x512xf32>, i32 -> vector<8x512xf32>
    %60 = vector.extract_strided_slice %1 {offsets = [3, 0], sizes = [1, 512], strides = [1, 1]} : vector<9x512xf32> to vector<1x512xf32>
    %61 = vector.broadcast %60 : vector<1x512xf32> to vector<8x512xf32>
    %62 = arith.mulf %59, %61 : vector<8x512xf32>
    %c511_i32_17 = arith.constant 511 : i32
    %63 = tpu.dynamic_rotate %45 by %c511_i32_17 dim 1 : vector<8x512xf32>, i32 -> vector<8x512xf32>
    %64 = vector.extract_strided_slice %1 {offsets = [5, 0], sizes = [1, 512], strides = [1, 1]} : vector<9x512xf32> to vector<1x512xf32>
    %65 = vector.broadcast %64 : vector<1x512xf32> to vector<8x512xf32>
    %66 = arith.mulf %63, %65 : vector<8x512xf32>
    %c497_i32_18 = arith.constant 497 : i32
    %67 = tpu.dynamic_rotate %45 by %c497_i32_18 dim 1 : vector<8x512xf32>, i32 -> vector<8x512xf32>
    %68 = vector.extract_strided_slice %1 {offsets = [6, 0], sizes = [1, 512], strides = [1, 1]} : vector<9x512xf32> to vector<1x512xf32>
    %69 = vector.broadcast %68 : vector<1x512xf32> to vector<8x512xf32>
    %70 = arith.mulf %67, %69 : vector<8x512xf32>
    %c496_i32_19 = arith.constant 496 : i32
    %71 = tpu.dynamic_rotate %45 by %c496_i32_19 dim 1 : vector<8x512xf32>, i32 -> vector<8x512xf32>
    %72 = vector.extract_strided_slice %1 {offsets = [7, 0], sizes = [1, 512], strides = [1, 1]} : vector<9x512xf32> to vector<1x512xf32>
    %73 = vector.broadcast %72 : vector<1x512xf32> to vector<8x512xf32>
    %74 = arith.mulf %71, %73 : vector<8x512xf32>
    %c495_i32_20 = arith.constant 495 : i32
    %75 = tpu.dynamic_rotate %45 by %c495_i32_20 dim 1 : vector<8x512xf32>, i32 -> vector<8x512xf32>
    %76 = vector.extract_strided_slice %1 {offsets = [8, 0], sizes = [1, 512], strides = [1, 1]} : vector<9x512xf32> to vector<1x512xf32>
    %77 = vector.broadcast %76 : vector<1x512xf32> to vector<8x512xf32>
    %78 = arith.mulf %75, %77 : vector<8x512xf32>
    %79 = tpu.concatenate %50, %54, %58, %62, %45, %66, %70, %74, %78 in 0 : vector<8x512xf32>, vector<8x512xf32>, vector<8x512xf32>, vector<8x512xf32>, vector<8x512xf32>, vector<8x512xf32>, vector<8x512xf32>, vector<8x512xf32>, vector<8x512xf32> -> vector<72x512xf32>
    %cst_21 = arith.constant dense<0.000000e+00> : vector<8x512xf32>
    %80 = tpu.matmul %46, %79, %cst_21 {dimension_numbers = #tpu.dot_dimension_numbers<[1], [0], [0], [1], [0, 0, 1, 1], [], []>} : vector<8x72xf32>, vector<72x512xf32>, vector<8x512xf32> -> vector<8x512xf32>
    %81 = arith.addf %80, %0 : vector<8x512xf32>
    %82 = vector.broadcast %3 : vector<8x1xf32> to vector<8x512xf32>
    %83 = arith.mulf %81, %82 : vector<8x512xf32>
    %84 = vector.broadcast %4 : vector<8x1xf32> to vector<8x512xf32>
    %85 = arith.addf %83, %84 : vector<8x512xf32>
    %cst_22 = arith.constant -1.000000e+00 : f32
    %cst_23 = arith.constant 1.000000e+00 : f32
    %86 = vector.broadcast %cst_22 : f32 to vector<8x512xf32>
    %87 = arith.maximumf %86, %85 : vector<8x512xf32>
    %88 = vector.broadcast %cst_23 : f32 to vector<8x512xf32>
    %89 = arith.minimumf %88, %87 : vector<8x512xf32>
    %c0_24 = arith.constant 0 : index
    %c0_25 = arith.constant 0 : index
    %90 = vector.load %arg6[%c0_24, %c0_25] : memref<8x512xf32, #tpu.memory_space<vmem>>, vector<8x512xf32>
    tpu.vector_store %arg6[%c0_24, %c0_25], %89 {strides = array<i32>} : memref<8x512xf32, #tpu.memory_space<vmem>>, vector<8x512xf32>,
    return
  }
  func.func @transform_0(%arg0: i32) -> (i32, i32) {
    %c0_i32 = arith.constant 0 : i32
    %c0_i32_0 = arith.constant 0 : i32
    return %c0_i32, %arg0 : i32, i32
  }
  func.func @transform_1(%arg0: i32) -> (i32, i32) {
    %c0_i32 = arith.constant 0 : i32
    %c0_i32_0 = arith.constant 0 : i32
    %c0_i32_1 = arith.constant 0 : i32
    return %c0_i32, %c0_i32_0 : i32, i32
  }
  func.func @transform_2(%arg0: i32) -> (i32, i32) {
    %c0_i32 = arith.constant 0 : i32
    %c0_i32_0 = arith.constant 0 : i32
    %c0_i32_1 = arith.constant 0 : i32
    return %c0_i32, %c0_i32_0 : i32, i32
  }
  func.func @transform_3(%arg0: i32) -> (i32, i32) {
    %c0_i32 = arith.constant 0 : i32
    %c0_i32_0 = arith.constant 0 : i32
    %c0_i32_1 = arith.constant 0 : i32
    return %c0_i32, %c0_i32_0 : i32, i32
  }
  func.func @transform_4(%arg0: i32) -> (i32, i32) {
    %c0_i32 = arith.constant 0 : i32
    %c0_i32_0 = arith.constant 0 : i32
    %c0_i32_1 = arith.constant 0 : i32
    return %c0_i32, %c0_i32_0 : i32, i32
  }
  func.func @transform_5(%arg0: i32) -> (i32, i32) {
    %c0_i32 = arith.constant 0 : i32
    %c0_i32_0 = arith.constant 0 : i32
    return %c0_i32, %arg0 : i32, i32
  }
}

</mosaic_0001>

<bundles_post_ra>
// kernel: tpu_custom_call.1
= control target key start
LH: loop header
LB: loop body
LE: loop exit
PB: predicated region body
PF: predicated region fallthrough
CT: control target
= control target key end

     0   :  { %10 = vsyncpa [#allocation3], 0  ;;  %s1556_s0 = inlined_call_operand.hbm [shape: f32[8,512], index: 0, kind: input, shape index: {}]   ;;  %s1557_s1 = inlined_call_operand.vmem [shape: f32[8,72], index: 1, kind: input, shape index: {}]   ;;  %s1558_s2 = inlined_call_operand.vmem [shape: f32[8,72], index: 2, kind: input, shape index: {}]   ;;  %s1559_s3 = inlined_call_operand.hbm [shape: f32[9,512], index: 3, kind: input, shape index: {}]   ;;  %s1560_s4 = inlined_call_operand.vmem [shape: f32[8,3], index: 4, kind: input, shape index: {}]   ;;  %s1561_s5 = inlined_call_operand.hbm [shape: f32[8,512], index: 5, kind: output, shape index: {}]  }
   0x1   :  { %11 = vsyncpa [#allocation6], 0 }
   0x2   :  { %12 = vsyncpa [#allocation4], 0  ;;  %s977_s18 = smov [#allocation2]   ;;  %s978_s20 = smov [#allocation5]  }
   0x3   :  { %s19_s19 = sshll.u32 %s977_s18, 4  ;;  %s32_s21 = sshll.u32 %s978_s20, 4  ;;  %s20_s19 = int_to_ptr.vmem [resolvable:$true] %s19_s19  ;;  %s1024_s21 = int_to_ptr.vmem [resolvable:$true] %s32_s21 }
   0x4   :  { %s905_s24 = scalar_lea.hbm %s1556_s0, 512 }
   0x5   :  { %p906_p0 = scmp.ne.s32.totalorder %s1556_s0, %s905_s24  ;;  %p909_p1 = scmp.lt.u32.totalorder %s905_s24, %s1556_s0 }
   0x7   :  { %p911_p2 = pnand %p909_p1, %p906_p0 }
   0x9   :  { %914 = shalt.err (!%p911_p2)
}
   0xa   :  { %s915_s29 = scalar_lea.vmem %s20_s19, 512  ;;  %p920_p4 = scmp.lt.s32.totalorder %s20_s19, %s20_s19 }
   0xb   :  { %p916_p3 = scmp.ne.s32.totalorder %s20_s19, %s915_s29  ;;  %p921_p5 = scmp.lt.s32.totalorder %s915_s29, %s915_s29 }
   0xd   :  { %p922_p6 = por %p921_p5, %p920_p4 }
   0xf   :  { %p923_p7 = pnand %p922_p6, %p916_p3 }
  0x11   :  { %926 = shalt.err (!%p923_p7)
}
  0x12   :  { %22 = dma.hbm_to_vmem [thread:$0]  %s1556_s0, 512, %s20_s19, [#allocation3]  }
  0x13   :  { %s927_s9 = scalar_lea.hbm %s1559_s3, 1024 }
  0x14   :  { %p928_p8 = scmp.ne.s32.totalorder %s1559_s3, %s927_s9  ;;  %p931_p9 = scmp.lt.u32.totalorder %s927_s9, %s1559_s3 }
  0x16   :  { %p933_p10 = pnand %p931_p9, %p928_p8 }
  0x18   :  { %936 = shalt.err (!%p933_p10)
}
  0x19   :  { %s937_s14 = scalar_lea.vmem %s1024_s21, 1024  ;;  %p942_p12 = scmp.lt.s32.totalorder %s1024_s21, %s1024_s21 }
  0x1a   :  { %p938_p11 = scmp.ne.s32.totalorder %s1024_s21, %s937_s14  ;;  %p943_p13 = scmp.lt.s32.totalorder %s937_s14, %s937_s14 }
  0x1c   :  { %p944_p0 = por %p943_p13, %p942_p12 }
  0x1e   :  { %p945_p1 = pnand %p944_p0, %p938_p11 }
  0x20   :  { %948 = shalt.err (!%p945_p1)
}
  0x21   :  { %s979_s0 = smov 512   ;;  %s980_s15 = smov 32  }
  0x22   :  { %38 = dma.hbm_to_vmem [thread:$0]  %s1559_s3, 1024, %s1024_s21, [#allocation6], %s979_s0, %s979_s0, %s980_s15  }
  0x23   :  { %971 = dma.done.wait [#allocation3], 512  }
  0x24   :  { %972 = vsyncadd [#allocation3], 4294966784 }
  0x25   :  { %973 = dma.done.wait [#allocation6], 1024  }
  0x26   :  { %974 = vsyncadd [#allocation6], 4294966272  ;;  %v1055_v0 = vld [vmem:[#allocation2 + $0x10] sm:$0xff]  ;;  %v1057_v1 = vld [vmem:[#allocation2] sm:$0xff]  ;;  %s981_s18 = smov 17   ;;  %s982_s3 = smov 16   ;;  %v69_v7 = vlaneseq }
  0x27   :  { %65 = vrot.lane.b32.xlu1 %v1055_v0, %s981_s18  ;;  %61 = vrot.lane.b32.xlu0 %v1057_v1, %s981_s18  ;;  %v1063_v2 = vld [vmem:[#allocation2 + $0x18] sm:$0xff]  ;;  %v1065_v3 = vld [vmem:[#allocation2 + $0x8] sm:$0xff]  ;;  %s983_s19 = smov 15   ;;  %s984_s20 = smov 1   ;;  %v988_v4 = vmov 0.0   ;;  %v989_v5 = vmov 0  }
  0x28   :  { %s985_s21 = smov 127   ;;  %s986_s22 = smov 113   ;;  %400 = vmatprep.mubr.f32.mxu0 %v988_v4  ;;  %471 = vmatprep.mubr.f32.mxu1 %v988_v4  ;;  %v1132_v6 = vld [vmem:[%s1560_s4] sm:$0xff]  ;;  %v1135_v8 = vshrl.u32 %v69_v7, 7  ;;  %v1137_v11 = vand.u32 127, %v69_v7  ;;  %v1141_v14 = vld [vmem:[#allocation5 + $0x8] sm:$0xff] }
  0x29   :  { %s987_s23 = smov 112   ;;  %901 = vset.pattern.permute.xlu0 %v989_v5  ;;  %s990_s24 = smov 111   ;;  %v1144_v17 = vld [vmem:[#allocation5] sm:$0xff]  ;;  %v1146_v18 = vld [vmem:[#allocation5 + $0x10] sm:$0xff]  ;;  %v1155_v21 = vld [vmem:[#allocation5 + $0x18] sm:$0xff]  ;;  %vm332_vm8 = vcmask 588800  }
  0x2a   :  { %v78_v12 = vsub.s32 0, %v1135_v8  ;;  %v111_v13 = vsub.s32 1, %v1135_v8  ;;  %vm71_vm0 = vcmp.lt.s32.totalorder %v1137_v11, 17  ;;  %vm104_vm1 = vcmp.lt.s32.totalorder %v1137_v11, 16 }
  0x2b   :  { %67 = vrot.lane.b32.xlu1 %v1063_v2, %s981_s18  ;;  %63 = vrot.lane.b32.xlu0 %v1065_v3, %s981_s18  ;;  %v144_v54 = vsub.s32 2, %v1135_v8  ;;  %v177_v55 = vsub.s32 3, %v1135_v8  ;;  %vm137_vm2 = vcmp.lt.s32.totalorder %v1137_v11, 15  ;;  %vm170_vm3 = vcmp.lt.s32.totalorder %v1137_v11, 1 }
  0x2c   :  { %v1150_v19 = vrot.slane %v1141_v14, %v78_v12  ;;  %v1153_v20 = vrot.slane %v1141_v14, %v111_v13  ;;  %v1160_v23 = vrot.slane %v1144_v17, %v78_v12  ;;  %v1163_v24 = vrot.slane %v1146_v18, %v78_v12 }
  0x2d   :  { %v1166_v27 = vrot.slane %v1144_v17, %v111_v13  ;;  %v1173_v30 = vrot.slane %v1146_v18, %v111_v13  ;;  %v1176_v31 = vrot.slane %v1155_v21, %v78_v12  ;;  %v1183_v35 = vrot.slane %v1155_v21, %v111_v13 }
  0x2e   :  { %v1203_v58 = vrot.slane %v1141_v14, %v144_v54  ;;  %v1207_v59 = vrot.slane %v1141_v14, %v177_v55  ;;  %v1212_v61 = vrot.slane %v1144_v17, %v144_v54  ;;  %v1215_v62 = vrot.slane %v1146_v18, %v144_v54 }
  0x2f   :  { %98 = vrot.lane.b32.xlu1 %v1065_v3, %s982_s3  ;;  %96 = vrot.lane.b32.xlu0 %v1057_v1, %s982_s3  ;;  %v1218_v63 = vrot.slane %v1155_v21, %v144_v54  ;;  %v1225_v12 = vrot.slane %v1144_v17, %v177_v55  ;;  %v1228_v13 = vrot.slane %v1146_v18, %v177_v55  ;;  %vm203_vm4 = vcmp.lt.s32.totalorder %v1137_v11, 127 }
  0x30   :  { %vm269_vm5 = vcmp.lt.s32.totalorder %v1137_v11, 112  ;;  %vm236_vm6 = vcmp.lt.s32.totalorder %v1137_v11, 113  ;;  %vm302_vm7 = vcmp.lt.s32.totalorder %v1137_v11, 111 }
  0x33   :  { %102 = vrot.lane.b32.xlu1 %v1063_v2, %s982_s3  ;;  %100 = vrot.lane.b32.xlu0 %v1055_v0, %s982_s3 }
  0x37   :  { %131 = vrot.lane.b32.xlu1 %v1065_v3, %s983_s19  ;;  %129 = vrot.lane.b32.xlu0 %v1057_v1, %s983_s19 }
  0x3b   :  { %135 = vrot.lane.b32.xlu1 %v1063_v2, %s983_s19  ;;  %133 = vrot.lane.b32.xlu0 %v1055_v0, %s983_s19 }
  0x3f   :  { %164 = vrot.lane.b32.xlu1 %v1065_v3, %s984_s20  ;;  %162 = vrot.lane.b32.xlu0 %v1057_v1, %s984_s20 }
  0x43   :  { %168 = vrot.lane.b32.xlu1 %v1063_v2, %s984_s20  ;;  %166 = vrot.lane.b32.xlu0 %v1055_v0, %s984_s20 }
  0x47   :  { %197 = vrot.lane.b32.xlu1 %v1065_v3, %s985_s21  ;;  %195 = vrot.lane.b32.xlu0 %v1057_v1, %s985_s21 }
  0x4b   :  { %201 = vrot.lane.b32.xlu1 %v1063_v2, %s985_s21  ;;  %199 = vrot.lane.b32.xlu0 %v1055_v0, %s985_s21 }
  0x4f   :  { %230 = vrot.lane.b32.xlu1 %v1065_v3, %s986_s22  ;;  %228 = vrot.lane.b32.xlu0 %v1057_v1, %s986_s22 }
  0x53   :  { %234 = vrot.lane.b32.xlu1 %v1063_v2, %s986_s22  ;;  %232 = vrot.lane.b32.xlu0 %v1055_v0, %s986_s22 }
  0x57   :  { %263 = vrot.lane.b32.xlu1 %v1065_v3, %s987_s23  ;;  %261 = vrot.lane.b32.xlu0 %v1057_v1, %s987_s23 }
  0x5b   :  { %267 = vrot.lane.b32.xlu1 %v1063_v2, %s987_s23  ;;  %265 = vrot.lane.b32.xlu0 %v1055_v0, %s987_s23 }
  0x5f   :  { %296 = vrot.lane.b32.xlu1 %v1065_v3, %s990_s24  ;;  %294 = vrot.lane.b32.xlu0 %v1057_v1, %s990_s24 }
  0x63   :  { %300 = vrot.lane.b32.xlu1 %v1063_v2, %s990_s24  ;;  %298 = vrot.lane.b32.xlu0 %v1055_v0, %s990_s24 }
  0x67   :  { %329 = vperm.xlu0 %901, %v1132_v6  }
  0x99   :  { %v66_v9 = vpop.permute.xlu1 %65  ;;  %v62_v10 = vpop.permute.xlu0 %61 }
  0x9d   :  { %v68_v15 = vpop.permute.xlu1 %67  ;;  %v64_v16 = vpop.permute.xlu0 %63 }
  0x9e   :  { %v74_v22 = vsel %vm71_vm0, %v62_v10, %v64_v16  ;;  %v75_v28 = vsel %vm71_vm0, %v68_v15, %v62_v10  ;;  %v73_v32 = vsel %vm71_vm0, %v64_v16, %v66_v9  ;;  %v72_v36 = vsel %vm71_vm0, %v66_v9, %v68_v15 }
  0x9f   :  { %v93_v33 = vmul.f32 %v1150_v19, %v74_v22  ;;  %v92_v37 = vmul.f32 %v1160_v23, %v75_v28  ;;  %v94_v41 = vmul.f32 %v1163_v24, %v73_v32  ;;  %v95_v47 = vmul.f32 %v1176_v31, %v72_v36 }
  0xa1   :  { %v99_v25 = vpop.permute.xlu1 %98  ;;  %v97_v26 = vpop.permute.xlu0 %96 }
  0xa2   :  { %v107_v29 = vsel %vm104_vm1, %v97_v26, %v99_v25 }
  0xa3   :  { %v126_v34 = vmul.f32 %v1153_v20, %v107_v29 }
  0xa5   :  { %v103_v38 = vpop.permute.xlu1 %102  ;;  %v101_v39 = vpop.permute.xlu0 %100  ;;  %v820_v40 = vpack.c.bf16 %v126_v34, %v93_v33  ;;  %v210_v34 = vsub.s32 5, %v1135_v8 }
  0xa6   :  { %v108_v42 = vsel %vm104_vm1, %v103_v38, %v97_v26  ;;  %v105_v43 = vsel %vm104_vm1, %v101_v39, %v103_v38  ;;  %v106_v44 = vsel %vm104_vm1, %v99_v25, %v101_v39  ;;  %v1235_v25 = vrot.slane %v1155_v21, %v177_v55 }
  0xa7   :  { %v125_v45 = vmul.f32 %v1166_v27, %v108_v42  ;;  %v127_v46 = vmul.f32 %v1173_v30, %v106_v44  ;;  %821 = vmatprep.subr.bf16.mxu0 %v820_v40  ;;  %v128_v48 = vmul.f32 %v1183_v35, %v105_v43 }
  0xa9   :  { %v132_v49 = vpop.permute.xlu1 %131  ;;  %v130_v50 = vpop.permute.xlu0 %129  ;;  %v822_v51 = vpack.c.bf16 %v125_v45, %v92_v37  ;;  %v836_v52 = vpack.c.bf16 %v128_v48, %v95_v47  ;;  %v838_v53 = vpack.c.bf16 %v127_v46, %v94_v41 }
  0xaa   :  { %v140_v60 = vsel %vm137_vm2, %v130_v50, %v132_v49 }
  0xab   :  { %823 = vmatpush1.bf16.msra.mxu0 %v822_v51  ;;  %837 = vmatprep.subr.bf16.mxu1 %v836_v52  ;;  %v159_v15 = vmul.f32 %v1203_v58, %v140_v60  ;;  %v1262_v52 = vrot.slane %v1141_v14, %v210_v34 }
  0xac   :  { %839 = vmatpush1.bf16.msra.mxu1 %v838_v53  ;;  %v1265_v53 = vrot.slane %v1146_v18, %v210_v34 }
  0xad   :  { %v136_v56 = vpop.permute.xlu1 %135  ;;  %v134_v57 = vpop.permute.xlu0 %133 }
  0xae   :  { %v141_v9 = vsel %vm137_vm2, %v136_v56, %v130_v50  ;;  %v139_v16 = vsel %vm137_vm2, %v132_v49, %v134_v57  ;;  %v138_v26 = vsel %vm137_vm2, %v134_v57, %v136_v56  ;;  %v1254_v49 = vrot.slane %v1144_v17, %v210_v34 }
  0xaf   :  { %v158_v28 = vmul.f32 %v1212_v61, %v141_v9  ;;  %v160_v36 = vmul.f32 %v1215_v62, %v139_v16  ;;  %v161_v40 = vmul.f32 %v1218_v63, %v138_v26  ;;  %v1257_v50 = vrot.slane %v1155_v21, %v210_v34 }
  0xb0   :  { %v276_v34 = vsub.s32 7, %v1135_v8 }
  0xb1   :  { %v165_v5 = vpop.permute.xlu1 %164  ;;  %v163_v7 = vpop.permute.xlu0 %162 }
  0xb2   :  { %v173_v10 = vsel %vm170_vm3, %v163_v7, %v165_v5 }
  0xb3   :  { %v192_v22 = vmul.f32 %v1207_v59, %v173_v10 }
  0xb5   :  { %v169_v29 = vpop.permute.xlu1 %168  ;;  %v167_v32 = vpop.permute.xlu0 %166  ;;  %v824_v33 = vpack.c.bf16 %v192_v22, %v159_v15 }
  0xb6   :  { %v174_v37 = vsel %vm170_vm3, %v169_v29, %v163_v7  ;;  %v171_v38 = vsel %vm170_vm3, %v167_v32, %v169_v29  ;;  %v172_v39 = vsel %vm170_vm3, %v165_v5, %v167_v32 }
  0xb7   :  { %v191_v41 = vmul.f32 %v1225_v12, %v174_v37  ;;  %v193_v42 = vmul.f32 %v1228_v13, %v172_v39  ;;  %v194_v43 = vmul.f32 %v1235_v25, %v171_v38  ;;  %825 = vmatprep.subr.bf16.mxu0 %v824_v33 }
  0xb9   :  { %v198_v44 = vpop.permute.xlu1 %197  ;;  %v196_v45 = vpop.permute.xlu0 %195  ;;  %v826_v46 = vpack.c.bf16 %v191_v41, %v158_v28  ;;  %v840_v47 = vpack.c.bf16 %v194_v43, %v161_v40  ;;  %v842_v48 = vpack.c.bf16 %v193_v42, %v160_v36  ;;  %v243_v36 = vsub.s32 6, %v1135_v8 }
  0xba   :  { %v206_v51 = vsel %vm203_vm4, %v196_v45, %v198_v44  ;;  %v1299_v43 = vrot.slane %v1144_v17, %v276_v34 }
  0xbb   :  { %827 = vmatpush1.bf16.msra.mxu0 %v826_v46  ;;  %841 = vmatprep.subr.bf16.mxu1 %v840_v47  ;;  %v224_v56 = vmul.f32 %v1254_v49, %v206_v51  ;;  %v1286_v37 = vrot.slane %v1155_v21, %v243_v36  ;;  %v1289_v38 = vrot.slane %v1141_v14, %v243_v36 }
  0xbc   :  { %843 = vmatpush1.bf16.msra.mxu1 %v842_v48  ;;  %v1294_v42 = vrot.slane %v1146_v18, %v243_v36  ;;  %v1307_v46 = vrot.slane %v1141_v14, %v276_v34  ;;  %v1310_v47 = vrot.slane %v1146_v18, %v276_v34  ;;  %v1313_v48 = vrot.slane %v1144_v17, %v243_v36  ;;  %v1338_v36 = vld [vmem:[#allocation5 + $0x30] ss:$0 sm:$0xff] }
  0xbd   :  { %v202_v54 = vpop.permute.xlu1 %201  ;;  %v200_v55 = vpop.permute.xlu0 %199  ;;  %v830_v29 = vpack.c.bf16 %v224_v56, %v1057_v1 }
  0xbe   :  { %v207_v57 = vsel %vm203_vm4, %v202_v54, %v196_v45  ;;  %v204_v60 = vsel %vm203_vm4, %v200_v55, %v202_v54  ;;  %v205_v5 = vsel %vm203_vm4, %v198_v44, %v200_v55  ;;  %v1304_v45 = vrot.slane %v1155_v21, %v276_v34  ;;  %v1336_v34 = vld [vmem:[#allocation5 + $0x28] ss:$0 sm:$0xff] }
  0xbf   :  { %v227_v7 = vmul.f32 %v1257_v50, %v207_v57  ;;  %v225_v9 = vmul.f32 %v1262_v52, %v205_v5  ;;  %v226_v10 = vmul.f32 %v1265_v53, %v204_v60 }
  0xc1   :  { %v231_v15 = vpop.permute.xlu1 %230  ;;  %v229_v16 = vpop.permute.xlu0 %228  ;;  %v828_v22 = vpack.c.bf16 %v225_v9, %v1065_v3  ;;  %v844_v26 = vpack.c.bf16 %v227_v7, %v1063_v2  ;;  %v846_v28 = vpack.c.bf16 %v226_v10, %v1055_v0 }
  0xc2   :  { %v239_v54 = vsel %vm236_vm6, %v229_v16, %v231_v15 }
  0xc3   :  { %829 = vmatprep.subr.bf16.mxu0 %v828_v22  ;;  %845 = vmatprep.subr.bf16.mxu1 %v844_v26 }
  0xc4   :  { %831 = vmatpush1.bf16.msra.mxu0 %v830_v29  ;;  %847 = vmatpush1.bf16.msra.mxu1 %v846_v28 }
  0xc5   :  { %v235_v32 = vpop.permute.xlu1 %234  ;;  %v233_v33 = vpop.permute.xlu0 %232 }
  0xc6   :  { %v240_v41 = vsel %vm236_vm6, %v235_v32, %v229_v16  ;;  %v238_v8 = vsel %vm236_vm6, %v231_v15, %v233_v33  ;;  %v237_v51 = vsel %vm236_vm6, %v233_v33, %v235_v32  ;;  %v257_v15 = vmul.f32 %v1313_v48, %v239_v54  ;;  %v1334_v33 = vld [vmem:[#allocation5 + $0x38] ss:$0 sm:$0xff] }
  0xc7   :  { %v260_v55 = vmul.f32 %v1286_v37, %v240_v41  ;;  %v258_v21 = vmul.f32 %v1289_v38, %v238_v8  ;;  %v259_v5 = vmul.f32 %v1294_v42, %v237_v51 }
  0xc9   :  { %v264_v39 = vpop.permute.xlu1 %263  ;;  %v262_v40 = vpop.permute.xlu0 %261 }
  0xca   :  { %v272_v44 = vsel %vm269_vm5, %v262_v40, %v264_v39 }
  0xcb   :  { %v290_v14 = vmul.f32 %v1299_v43, %v272_v44 }
  0xcd   :  { %v268_v56 = vpop.permute.xlu1 %267  ;;  %v266_v57 = vpop.permute.xlu0 %265  ;;  %v834_v32 = vpack.c.bf16 %v290_v14, %v257_v15  ;;  %v60_v14 = vld [vmem:[%s1557_s1] sm:$0xff] }
  0xce   :  { %v273_v18 = vsel %vm269_vm5, %v268_v56, %v262_v40  ;;  %v270_v17 = vsel %vm269_vm5, %v266_v57, %v268_v56  ;;  %v271_v60 = vsel %vm269_vm5, %v264_v39, %v266_v57  ;;  %v1340_v39 = vld [vmem:[#allocation5 + $0x20] ss:$0 sm:$0xff] }
  0xcf   :  { %v293_v7 = vmul.f32 %v1304_v45, %v273_v18  ;;  %v291_v9 = vmul.f32 %v1307_v46, %v271_v60  ;;  %v292_v10 = vmul.f32 %v1310_v47, %v270_v17 }
  0xd1   :  { %v297_v16 = vpop.permute.xlu1 %296  ;;  %v295_v22 = vpop.permute.xlu0 %294  ;;  %v832_v26 = vpack.c.bf16 %v291_v9, %v258_v21  ;;  %v848_v28 = vpack.c.bf16 %v293_v7, %v260_v55  ;;  %v850_v29 = vpack.c.bf16 %v292_v10, %v259_v5 }
  0xd2   :  { %v305_v40 = vsel %vm302_vm7, %v295_v22, %v297_v16 }
  0xd3   :  { %833 = vmatprep.subr.bf16.mxu0 %v832_v26  ;;  %849 = vmatprep.subr.bf16.mxu1 %v848_v28  ;;  %v323_v57 = vmul.f32 %v1340_v39, %v305_v40 }
  0xd4   :  { %835 = vmatpush1.bf16.msra.mxu0 %v834_v32  ;;  %851 = vmatpush1.bf16.msra.mxu1 %v850_v29  ;;  %v991_v29 = vmov 1   ;;  %v992_v32 = vmov 2  }
  0xd5   :  { %v301_v41 = vpop.permute.xlu1 %300  ;;  %v299_v8 = vpop.permute.xlu0 %298  ;;  %902 = vset.pattern.permute.xlu0 %v991_v29  ;;  %903 = vset.pattern.permute.xlu1 %v992_v32 }
  0xd6   :  { %v306_v44 = vsel %vm302_vm7, %v301_v41, %v295_v22  ;;  %v303_v51 = vsel %vm302_vm7, %v299_v8, %v301_v41  ;;  %v304_v54 = vsel %vm302_vm7, %v297_v16, %v299_v8 }
  0xd7   :  { %v326_v55 = vmul.f32 %v1334_v33, %v306_v44  ;;  %v324_v21 = vmul.f32 %v1336_v34, %v304_v54  ;;  %v325_v56 = vmul.f32 %v1338_v36, %v303_v51 }
  0xd9   :  { %352 = vmatprep.subr.mxu0 %v324_v21  ;;  %423 = vmatprep.subr.mxu1 %v326_v55 }
  0xda   :  { %353 = vmatpush1.msra.mxu0 %v323_v57  ;;  %424 = vmatpush1.msra.mxu1 %v325_v56 }
  0xdb   :  { %808 = vmatmul.mubr.msk.f32.vlgmr.msra.gmra.mrb[0].mxu0 %vm332_vm8, %v60_v14  ;;  %809 = vmatmul.mubr.msk.f32.vlgmr.msra.gmra.mrb[0].mxu1 %vm332_vm8, %v60_v14 }
  0xdc   :  { %682 = vmatprep.mubr.f32.mxu0 %v988_v4  ;;  %753 = vmatprep.mubr.f32.mxu1 %v988_v4 }
  0xe6   :  { %v330_v18 = vpop.permute.xlu0 %329 }
 0x1ae   :  { %v402_v17 = vpop.f32.mrb[0].mxu0  ;;  %v473_v60 = vpop.f32.mrb[0].mxu1 }
 0x1af   :  { %v403_v5 = vadd.f32 %v402_v17, %v330_v18  ;;  %v474_v7 = vadd.f32 %v473_v60, %v330_v18  ;;  %v404_v9 = vpop.f32.mrb[1].mxu0  ;;  %v475_v10 = vpop.f32.mrb[1].mxu1 }
 0x1b0   :  { %v405_v22 = vadd.f32 %v404_v9, %v330_v18  ;;  %v476_v4 = vadd.f32 %v475_v10, %v330_v18 }
 0x1b1   :  { %v1361_v15 = vclamps-f32 %v403_v5, 1.0  ;;  %v1363_v16 = vclamps-f32 %v474_v7, 1.0 }
 0x1b2   :  { %v1369_v26 = vclamps-f32 %v405_v22, 1.0  ;;  %v1375_v28 = vclamps-f32 %v476_v4, 1.0 }
 0x1b3   :  { %491 = vrot.lane.b32.xlu0 %v1363_v16, %s981_s18  ;;  %487 = vrot.lane.b32.xlu1 %v1361_v15, %s981_s18 }
 0x1b7   :  { %503 = vrot.lane.b32.xlu0 %v1361_v15, %s982_s3  ;;  %489 = vrot.lane.b32.xlu1 %v1369_v26, %s981_s18 }
 0x1bb   :  { %507 = vrot.lane.b32.xlu0 %v1363_v16, %s982_s3  ;;  %493 = vrot.lane.b32.xlu1 %v1375_v28, %s981_s18 }
 0x1bf   :  { %519 = vrot.lane.b32.xlu0 %v1361_v15, %s983_s19  ;;  %505 = vrot.lane.b32.xlu1 %v1369_v26, %s982_s3 }
 0x1c3   :  { %523 = vrot.lane.b32.xlu0 %v1363_v16, %s983_s19  ;;  %509 = vrot.lane.b32.xlu1 %v1375_v28, %s982_s3 }
 0x1c7   :  { %535 = vrot.lane.b32.xlu0 %v1361_v15, %s984_s20  ;;  %521 = vrot.lane.b32.xlu1 %v1369_v26, %s983_s19 }
 0x1cb   :  { %539 = vrot.lane.b32.xlu0 %v1363_v16, %s984_s20  ;;  %525 = vrot.lane.b32.xlu1 %v1375_v28, %s983_s19 }
 0x1cf   :  { %551 = vrot.lane.b32.xlu0 %v1361_v15, %s985_s21  ;;  %537 = vrot.lane.b32.xlu1 %v1369_v26, %s984_s20 }
 0x1d3   :  { %555 = vrot.lane.b32.xlu0 %v1363_v16, %s985_s21  ;;  %541 = vrot.lane.b32.xlu1 %v1375_v28, %s984_s20 }
 0x1d7   :  { %567 = vrot.lane.b32.xlu0 %v1361_v15, %s986_s22  ;;  %553 = vrot.lane.b32.xlu1 %v1369_v26, %s985_s21 }
 0x1db   :  { %571 = vrot.lane.b32.xlu0 %v1363_v16, %s986_s22  ;;  %557 = vrot.lane.b32.xlu1 %v1375_v28, %s985_s21 }
 0x1df   :  { %583 = vrot.lane.b32.xlu0 %v1361_v15, %s987_s23  ;;  %569 = vrot.lane.b32.xlu1 %v1369_v26, %s986_s22 }
 0x1e3   :  { %587 = vrot.lane.b32.xlu0 %v1363_v16, %s987_s23  ;;  %573 = vrot.lane.b32.xlu1 %v1375_v28, %s986_s22 }
 0x1e7   :  { %599 = vrot.lane.b32.xlu0 %v1361_v15, %s990_s24  ;;  %585 = vrot.lane.b32.xlu1 %v1369_v26, %s987_s23 }
 0x1eb   :  { %603 = vrot.lane.b32.xlu0 %v1363_v16, %s990_s24  ;;  %589 = vrot.lane.b32.xlu1 %v1375_v28, %s987_s23 }
 0x1ef   :  { %601 = vrot.lane.b32.xlu1 %v1369_v26, %s990_s24  ;;  %761 = vperm.xlu0 %902, %v1132_v6  }
 0x1f3   :  { %605 = vrot.lane.b32.xlu1 %v1375_v28, %s990_s24  ;;  %904 = vset.pattern.permute.xlu0 %v992_v32 }
 0x1f7   :  { %769 = vperm.xlu1 %903, %v1132_v6  }
 0x225   :  { %v492_v40 = vpop.permute.xlu0 %491  ;;  %v488_v41 = vpop.permute.xlu1 %487 }
 0x229   :  { %v504_v8 = vpop.permute.xlu0 %503  ;;  %v490_v44 = vpop.permute.xlu1 %489 }
 0x22a   :  { %v497_v55 = vsel %vm71_vm0, %v488_v41, %v490_v44  ;;  %v496_v5 = vsel %vm71_vm0, %v490_v44, %v492_v40 }
 0x22b   :  { %v500_v14 = vmul.f32 %v497_v55, %v1150_v19 }
 0x22d   :  { %v508_v51 = vpop.permute.xlu0 %507  ;;  %v494_v54 = vpop.permute.xlu1 %493 }
 0x22e   :  { %v495_v17 = vsel %vm71_vm0, %v492_v40, %v494_v54  ;;  %v498_v60 = vsel %vm71_vm0, %v494_v54, %v488_v41  ;;  %v501_v40 = vmul.f32 %v496_v5, %v1163_v24 }
 0x22f   :  { %v499_v4 = vmul.f32 %v498_v60, %v1160_v23  ;;  %v502_v29 = vmul.f32 %v495_v17, %v1176_v31 }
 0x231   :  { %v520_v21 = vpop.permute.xlu0 %519  ;;  %v506_v56 = vpop.permute.xlu1 %505 }
 0x232   :  { %v513_v57 = vsel %vm104_vm1, %v504_v8, %v506_v56  ;;  %v512_v18 = vsel %vm104_vm1, %v506_v56, %v508_v51 }
 0x233   :  { %v516_v6 = vmul.f32 %v513_v57, %v1153_v20  ;;  %v517_v22 = vmul.f32 %v512_v18, %v1173_v30 }
 0x235   :  { %v524_v7 = vpop.permute.xlu0 %523  ;;  %v510_v9 = vpop.permute.xlu1 %509  ;;  %v852_v10 = vpack.c.bf16 %v516_v6, %v500_v14  ;;  %v870_v56 = vpack.c.bf16 %v517_v22, %v501_v40 }
 0x236   :  { %v511_v19 = vsel %vm104_vm1, %v508_v51, %v510_v9  ;;  %v514_v20 = vsel %vm104_vm1, %v510_v9, %v504_v8 }
 0x237   :  { %v515_v32 = vmul.f32 %v514_v20, %v1166_v27  ;;  %v518_v41 = vmul.f32 %v511_v19, %v1183_v35  ;;  %853 = vmatprep.subr.bf16.mxu0 %v852_v10 }
 0x239   :  { %v854_v44 = vpack.c.bf16 %v515_v32, %v499_v4  ;;  %v536_v54 = vpop.permute.xlu0 %535  ;;  %v522_v30 = vpop.permute.xlu1 %521  ;;  %v868_v55 = vpack.c.bf16 %v518_v41, %v502_v29 }
 0x23a   :  { %v529_v23 = vsel %vm137_vm2, %v520_v21, %v522_v30  ;;  %v528_v17 = vsel %vm137_vm2, %v522_v30, %v524_v7 }
 0x23b   :  { %855 = vmatpush1.bf16.msra.mxu0 %v854_v44  ;;  %869 = vmatprep.subr.bf16.mxu1 %v868_v55  ;;  %v532_v24 = vmul.f32 %v529_v23, %v1203_v58 }
 0x23c   :  { %871 = vmatpush1.bf16.msra.mxu1 %v870_v56 }
 0x23d   :  { %v540_v8 = vpop.permute.xlu0 %539  ;;  %v526_v51 = vpop.permute.xlu1 %525 }
 0x23e   :  { %v527_v18 = vsel %vm137_vm2, %v524_v7, %v526_v51  ;;  %v530_v6 = vsel %vm137_vm2, %v526_v51, %v520_v21  ;;  %v533_v7 = vmul.f32 %v528_v17, %v1215_v62 }
 0x23f   :  { %v531_v22 = vmul.f32 %v530_v6, %v1212_v61  ;;  %v534_v19 = vmul.f32 %v527_v18, %v1218_v63 }
 0x241   :  { %v552_v31 = vpop.permute.xlu0 %551  ;;  %v538_v27 = vpop.permute.xlu1 %537 }
 0x242   :  { %v545_v35 = vsel %vm170_vm3, %v536_v54, %v538_v27  ;;  %v544_v57 = vsel %vm170_vm3, %v538_v27, %v540_v8 }
 0x243   :  { %v548_v14 = vmul.f32 %v545_v35, %v1207_v59  ;;  %v549_v10 = vmul.f32 %v544_v57, %v1228_v13 }
 0x245   :  { %v556_v60 = vpop.permute.xlu0 %555  ;;  %v542_v5 = vpop.permute.xlu1 %541  ;;  %v856_v9 = vpack.c.bf16 %v548_v14, %v532_v24  ;;  %v874_v41 = vpack.c.bf16 %v549_v10, %v533_v7 }
 0x246   :  { %v543_v58 = vsel %vm170_vm3, %v540_v8, %v542_v5  ;;  %v546_v59 = vsel %vm170_vm3, %v542_v5, %v536_v54 }
 0x247   :  { %v547_v21 = vmul.f32 %v546_v59, %v1225_v12  ;;  %v550_v20 = vmul.f32 %v543_v58, %v1235_v25  ;;  %857 = vmatprep.subr.bf16.mxu0 %v856_v9 }
 0x249   :  { %v858_v4 = vpack.c.bf16 %v547_v21, %v531_v22  ;;  %v568_v29 = vpop.permute.xlu0 %567  ;;  %v554_v13 = vpop.permute.xlu1 %553  ;;  %v872_v32 = vpack.c.bf16 %v550_v20, %v534_v19 }
 0x24a   :  { %v560_v40 = vsel %vm203_vm4, %v554_v13, %v556_v60  ;;  %v561_v61 = vsel %vm203_vm4, %v552_v31, %v554_v13 }
 0x24b   :  { %v563_v63 = vmul.f32 %v561_v61, %v1254_v49  ;;  %v564_v12 = vmul.f32 %v560_v40, %v1262_v52  ;;  %859 = vmatpush1.bf16.msra.mxu0 %v858_v4  ;;  %873 = vmatprep.subr.bf16.mxu1 %v872_v32 }
 0x24c   :  { %875 = vmatpush1.bf16.msra.mxu1 %v874_v41 }
 0x24d   :  { %v862_v62 = vpack.c.bf16 %v563_v63, %v1361_v15  ;;  %v572_v25 = vpop.permute.xlu0 %571  ;;  %v558_v44 = vpop.permute.xlu1 %557  ;;  %v860_v54 = vpack.c.bf16 %v564_v12, %v1369_v26 }
 0x24e   :  { %v559_v30 = vsel %vm203_vm4, %v556_v60, %v558_v44  ;;  %v562_v55 = vsel %vm203_vm4, %v558_v44, %v552_v31 }
 0x24f   :  { %v565_v56 = vmul.f32 %v559_v30, %v1265_v53  ;;  %v566_v49 = vmul.f32 %v562_v55, %v1257_v50  ;;  %861 = vmatprep.subr.bf16.mxu0 %v860_v54 }
 0x250   :  { %863 = vmatpush1.bf16.msra.mxu0 %v862_v62 }
 0x251   :  { %v878_v52 = vpack.c.bf16 %v565_v56, %v1363_v16  ;;  %v584_v8 = vpop.permute.xlu0 %583  ;;  %v570_v15 = vpop.permute.xlu1 %569  ;;  %v876_v51 = vpack.c.bf16 %v566_v49, %v1375_v28 }
 0x252   :  { %v576_v27 = vsel %vm236_vm6, %v570_v15, %v572_v25  ;;  %v577_v53 = vsel %vm236_vm6, %v568_v29, %v570_v15 }
 0x253   :  { %877 = vmatprep.subr.bf16.mxu1 %v876_v51  ;;  %v579_v35 = vmul.f32 %v577_v53, %v1313_v48  ;;  %v580_v28 = vmul.f32 %v576_v27, %v1289_v38 }
 0x254   :  { %879 = vmatpush1.bf16.msra.mxu1 %v878_v52 }
 0x255   :  { %v588_v26 = vpop.permute.xlu0 %587  ;;  %v574_v23 = vpop.permute.xlu1 %573 }
 0x256   :  { %v575_v18 = vsel %vm236_vm6, %v572_v25, %v574_v23  ;;  %v578_v6 = vsel %vm236_vm6, %v574_v23, %v568_v29 }
 0x257   :  { %v581_v48 = vmul.f32 %v575_v18, %v1294_v42 }
 0x259   :  { %v586_v31 = vpop.permute.xlu1 %585  ;;  %v600_v24 = vpop.permute.xlu0 %599 }
 0x25a   :  { %v592_v50 = vsel %vm269_vm5, %v586_v31, %v588_v26  ;;  %v593_v16 = vsel %vm269_vm5, %v584_v8, %v586_v31 }
 0x25b   :  { %v595_v57 = vmul.f32 %v593_v16, %v1299_v43  ;;  %v596_v14 = vmul.f32 %v592_v50, %v1307_v46  ;;  %v582_v43 = vmul.f32 %v578_v6, %v1286_v37 }
 0x25d   :  { %v866_v17 = vpack.c.bf16 %v595_v57, %v579_v35  ;;  %v590_v60 = vpop.permute.xlu1 %589  ;;  %v864_v5 = vpack.c.bf16 %v596_v14, %v580_v28  ;;  %v604_v58 = vpop.permute.xlu0 %603 }
 0x25e   :  { %v591_v9 = vsel %vm269_vm5, %v588_v26, %v590_v60  ;;  %v594_v38 = vsel %vm269_vm5, %v590_v60, %v584_v8 }
 0x25f   :  { %v597_v46 = vmul.f32 %v591_v9, %v1310_v47  ;;  %v598_v10 = vmul.f32 %v594_v38, %v1304_v45  ;;  %865 = vmatprep.subr.bf16.mxu0 %v864_v5  ;;  %v486_v45 = vld [vmem:[%s1558_s2] sm:$0xff]  ;;  %s993_s2 = smov [#allocation7]  }
 0x260   :  { %867 = vmatpush1.bf16.msra.mxu0 %v866_v17  ;;  %s794_s29 = sshll.u32 %s993_s2, 4  ;;  %s795_s29 = int_to_ptr.vmem [resolvable:$true] %s794_s29 }
 0x261   :  { %v882_v59 = vpack.c.bf16 %v597_v46, %v581_v48  ;;  %v602_v22 = vpop.permute.xlu1 %601  ;;  %v880_v19 = vpack.c.bf16 %v598_v10, %v582_v43  ;;  %s949_s30 = scalar_lea.vmem %s795_s29, 512  ;;  %p954_p3 = scmp.lt.s32.totalorder %s795_s29, %s795_s29 }
 0x262   :  { %v608_v21 = vsel %vm302_vm7, %v602_v22, %v604_v58  ;;  %v609_v20 = vsel %vm302_vm7, %v600_v24, %v602_v22  ;;  %p950_p2 = scmp.ne.s32.totalorder %s795_s29, %s949_s30  ;;  %p955_p4 = scmp.lt.s32.totalorder %s949_s30, %s949_s30 }
 0x263   :  { %v611_v42 = vmul.f32 %v1340_v39, %v609_v20  ;;  %v612_v37 = vmul.f32 %v1336_v34, %v608_v21  ;;  %881 = vmatprep.subr.bf16.mxu1 %v880_v19 }
 0x264   :  { %883 = vmatpush1.bf16.msra.mxu1 %v882_v59  ;;  %p956_p5 = por %p955_p4, %p954_p3 }
 0x265   :  { %634 = vmatprep.subr.mxu0 %v612_v37  ;;  %v606_v47 = vpop.permute.xlu1 %605 }
 0x266   :  { %v607_v7 = vsel %vm302_vm7, %v604_v58, %v606_v47  ;;  %v610_v4 = vsel %vm302_vm7, %v606_v47, %v600_v24  ;;  %635 = vmatpush1.msra.mxu0 %v611_v42  ;;  %p957_p6 = pnand %p956_p5, %p950_p2 }
 0x267   :  { %v613_v29 = vmul.f32 %v1338_v36, %v607_v7  ;;  %v614_v39 = vmul.f32 %v1334_v33, %v610_v4  ;;  %814 = vmatmul.mubr.msk.f32.vlgmr.msra.gmra.mrb[2].mxu0 %vm332_vm8, %v486_v45 }
 0x269   :  { %705 = vmatprep.subr.mxu1 %v614_v39 }
 0x26a   :  { %706 = vmatpush1.msra.mxu1 %v613_v29 }
 0x26b   :  { %815 = vmatmul.mubr.msk.f32.vlgmr.msra.gmra.mrb[2].mxu1 %vm332_vm8, %v486_v45 }
 0x26e   :  { %v762_v13 = vpop.permute.xlu0 %761 }
 0x276   :  { %v770_v11 = vpop.permute.xlu1 %769 }
 0x33a   :  { %v684_v34 = vpop.f32.mrb[2].mxu0 }
 0x33b   :  { %v685_v32 = vadd.f32 %v684_v34, %v1057_v1  ;;  %v686_v41 = vpop.f32.mrb[3].mxu0 }
 0x33c   :  { %v687_v40 = vadd.f32 %v686_v41, %v1065_v3 }
 0x33d   :  { %v764_v61 = vmul.f32 %v762_v13, %v685_v32 }
 0x33e   :  { %v755_v63 = vpop.f32.mrb[2].mxu1  ;;  %v765_v12 = vmul.f32 %v762_v13, %v687_v40 }
 0x33f   :  { %v756_v36 = vadd.f32 %v755_v63, %v1055_v0  ;;  %v757_v33 = vpop.f32.mrb[3].mxu1  ;;  %v772_v62 = vadd.f32 %v770_v11, %v764_v61 }
 0x340   :  { %v758_v25 = vadd.f32 %v757_v33, %v1063_v2  ;;  %v773_v44 = vadd.f32 %v770_v11, %v765_v12 }
 0x341   :  { %v766_v54 = vmul.f32 %v762_v13, %v756_v36  ;;  %v816_v30 = vclamps-f32 %v772_v62, 1.0 }
 0x342   :  { %v767_v55 = vmul.f32 %v762_v13, %v758_v25  ;;  %v817_v56 = vclamps-f32 %v773_v44, 1.0 }
 0x343   :  { %v774_v49 = vadd.f32 %v770_v11, %v766_v54  ;;  %784 = vst [vmem:[#allocation7] sm:$0xff] %v816_v30 }
 0x344   :  { %v775_v1 = vadd.f32 %v770_v11, %v767_v55  ;;  %785 = vst [vmem:[#allocation7 + $0x8] sm:$0xff] %v817_v56 }
 0x345   :  { %v818_v3 = vclamps-f32 %v774_v49, 1.0 }
 0x346   :  { %v819_v52 = vclamps-f32 %v775_v1, 1.0 }
 0x347   :  { %786 = vst [vmem:[#allocation7 + $0x10] sm:$0xff] %v818_v3 }
 0x348   :  { %787 = vst [vmem:[#allocation7 + $0x18] sm:$0xff] %v819_v52 }
 0x349   :  { %960 = shalt.err (!%p957_p6)
}
 0x34a   :  { %s961_s8 = scalar_lea.hbm %s1561_s5, 512 }
 0x34b   :  { %p962_p7 = scmp.ne.s32.totalorder %s1561_s5, %s961_s8  ;;  %p965_p8 = scmp.lt.u32.totalorder %s961_s8, %s1561_s5 }
 0x34d   :  { %p967_p9 = pnand %p965_p8, %p962_p7 }
 0x34f   :  { %970 = shalt.err (!%p967_p9)
}
 0x350   :  { %797 = dma.vmem_to_hbm [thread:$0]  %s795_s29, 512, %s1561_s5, [#allocation4]  }
 0x351   :  { %975 = dma.done.wait [#allocation4], 512  }
 0x352   :  { %976 = vsyncadd [#allocation4], 4294966784 }
 0x353   :  { %801 = vsyncpa [#allocation3], 1 }
 0x354   :  { %802 = vsyncpa [#allocation6], 1 }
 0x355   :  { %803 = vsyncpa [#allocation4], 1 }

</bundles_post_ra>
